<compile_context>
chip_gen: v5e
topology: v5e:2x2
jax: 0.10.0
libtpu: 0.0.40
codegen_flags: <defaults>
</compile_context>

<pallas_src>
import jax
import jax.numpy as jnp
from jax import lax
from jax.experimental import pallas as pl
from jax.experimental.pallas import tpu as pltpu


# ------------- fused FFN (fc1 + ReLU + fc2) + residual + LayerNorm -----------
def _ffn_kernel(x_ref, w1t_ref, b1_ref, w2t_ref, b2_ref, g_ref, beta_ref,
                o_ref, acc_ref):
    k = pl.program_id(1)

    @pl.when(k == 0)
    def _():
        acc_ref[...] = jnp.zeros_like(acc_ref)

    x = x_ref[...]                                          # (tm, M) f32
    w1t = w1t_ref[...]                                      # (M, tk) pre-cast
    # fc1 chunk + ReLU (elementwise -> exact under hidden-axis chunking)
    h = jnp.dot(x.astype(w1t.dtype), w1t,
                preferred_element_type=jnp.float32) + b1_ref[...]
    h = jnp.maximum(h, 0.0)
    # fc2 chunk, accumulated in the f32 VMEM scratch
    w2t = w2t_ref[...]                                      # (tk, M) pre-cast
    acc_ref[...] += jnp.dot(h.astype(w2t.dtype), w2t,
                            preferred_element_type=jnp.float32)

    @pl.when(k == pl.num_programs(1) - 1)
    def _():
        # dropout(p=0.0) is identity; bias + residual + LayerNorm in f32.
        y = acc_ref[...] + b2_ref[...] + x
        mu = jnp.mean(y, axis=-1, keepdims=True)
        var = jnp.mean((y - mu) ** 2, axis=-1, keepdims=True)
        y = (y - mu) * lax.rsqrt(var + 1e-5)
        o_ref[...] = (y * g_ref[...] + beta_ref[...]).astype(o_ref.dtype)


def prepare_params(torch_params, *, mxu_dtype=jnp.bfloat16):
    """One-time layout prep (hoisted): W -> W^T in the MXU dtype; vectors -> (1, N).

    Production default is bf16 weights (f32 MXU accumulation is kept in-kernel);
    pass mxu_dtype=jnp.float32 for bit-tight comparisons.
    """
    w1 = jnp.asarray(torch_params["w1"], jnp.float32)       # (H, M)
    w2 = jnp.asarray(torch_params["w2"], jnp.float32)       # (M, H)
    return {
        "w1t": w1.T.astype(mxu_dtype),                      # (M, H)
        "b1": jnp.asarray(torch_params["b1"], jnp.float32).reshape(1, -1),
        "w2t": w2.T.astype(mxu_dtype),                      # (H, M)
        "b2": jnp.asarray(torch_params["b2"], jnp.float32).reshape(1, -1),
        "gamma": jnp.asarray(torch_params["gamma"], jnp.float32).reshape(1, -1),
        "beta": jnp.asarray(torch_params["beta"], jnp.float32).reshape(1, -1),
    }


def _make_specs(tm, m, tk, kt, single_buffer_consts):
    def spec(shape, index_map, constant):
        if constant and single_buffer_consts:
            # Constant block index across the whole grid -> one VMEM copy.
            return pl.BlockSpec(shape, index_map, pipeline_mode=pl.Buffered(1))
        return pl.BlockSpec(shape, index_map)

    weights_const = kt == 1
    in_specs = [
        spec((tm, m), lambda i, k: (i, 0), False),            # x row tile
        spec((m, tk), lambda i, k: (0, k), weights_const),    # W1^T tile
        spec((1, tk), lambda i, k: (0, k), weights_const),    # b1 tile
        spec((tk, m), lambda i, k: (k, 0), weights_const),    # W2^T tile
        spec((1, m), lambda i, k: (0, 0), True),              # b2
        spec((1, m), lambda i, k: (0, 0), True),              # gamma
        spec((1, m), lambda i, k: (0, 0), True),              # beta
    ]
    out_spec = pl.BlockSpec((tm, m), lambda i, k: (i, 0))
    return in_specs, out_spec


def _vmem_limit_bytes(tm, m, tk, kt, w_itemsize):
    f32 = 4
    wbuf = 1 if kt == 1 else 2
    need = (2 * tm * m * f32               # x tile (double-buffered)
            + 2 * tm * m * f32             # out tile (double-buffered)
            + tm * m * f32                 # f32 accumulator scratch
            + wbuf * m * tk * w_itemsize   # W1^T tile(s)
            + wbuf * tk * m * w_itemsize   # W2^T tile(s)
            + wbuf * tk * f32              # b1 tile(s)
            + 3 * m * f32)                 # b2, gamma, beta
    # Headroom x2, floor 32 MiB, ceiling 64 MiB (v7x per-core VMEM).
    return int(min(max(2 * need + (1 << 20), 32 << 20), 64 << 20))


def position_wise_feed_forward(x, prepped, *, row_tile=512, hidden_tile=512):
    """x: (B, S, dim_model) float32 -> (B, S, dim_model) float32."""
    b, s, m = x.shape
    hidden = prepped["w1t"].shape[1]
    n = b * s
    xf = x.reshape(n, m)

    # Row tile: single full block when small; otherwise 256-aligned (MXU tile).
    # No wrapper-side padding: grid rows = cdiv(n, tm), Pallas masks last block.
    if n <= row_tile:
        tm = n
    else:
        tm = min(max(256, (row_tile // 256) * 256), n)
    grid_rows = pl.cdiv(n, tm)

    # Hidden (K) tile: stream weights when hidden is large and cleanly divisible
    # by a lane-aligned tile; otherwise keep them fully resident (single tile).
    if hidden > hidden_tile and hidden_tile % 128 == 0 and hidden % hidden_tile == 0:
        tk = hidden_tile
    else:
        tk = hidden
    kt = hidden // tk

    vmem_limit = _vmem_limit_bytes(tm, m, tk, kt, prepped["w1t"].dtype.itemsize)

    def call(single_buffer_consts):
        in_specs, out_spec = _make_specs(tm, m, tk, kt, single_buffer_consts)
        return pl.pallas_call(
            _ffn_kernel,
            out_shape=jax.ShapeDtypeStruct((n, m), jnp.float32),
            grid=(grid_rows, kt),
            in_specs=in_specs,
            out_specs=out_spec,
            scratch_shapes=[pltpu.VMEM((tm, m), jnp.float32)],
            compiler_params=pltpu.CompilerParams(
                dimension_semantics=("parallel", "arbitrary"),
                vmem_limit_bytes=vmem_limit),
        )(xf, prepped["w1t"], prepped["b1"], prepped["w2t"], prepped["b2"],
          prepped["gamma"], prepped["beta"])

    try:
        out = call(True)
    except Exception:   # Buffered(1) unsupported by this Pallas -> default buffering
        out = call(False)

    return out.reshape(b, s, m)


# ------------------------------ pure-JAX reference ---------------------------
def _reference(x, tp):
    h = jnp.maximum(x @ jnp.asarray(tp["w1"]).T + tp["b1"], 0.0)
    y = h @ jnp.asarray(tp["w2"]).T + tp["b2"]
    y = y + x
    mu = jnp.mean(y, axis=-1, keepdims=True)
    var = jnp.mean((y - mu) ** 2, axis=-1, keepdims=True)
    y = (y - mu) * lax.rsqrt(var + 1e-5)
    return y * tp["gamma"] + tp["beta"]


def _make_params(keys, dim_model, hidden):
    def unif(k, shape, fan_in):
        bound = 1.0 / (fan_in ** 0.5)
        return jax.random.uniform(k, shape, jnp.float32, -bound, bound)
    return {
        "w1": unif(keys[0], (hidden, dim_model), dim_model),
        "b1": unif(keys[1], (hidden,), dim_model),
        "w2": unif(keys[2], (dim_model, hidden), hidden),
        "b2": unif(keys[3], (dim_model,), hidden),
        "gamma": jnp.ones((dim_model,), jnp.float32),
        "beta": jnp.zeros((dim_model,), jnp.float32),
    }


# ----------------------------------- main -------------------------------------
if __name__ == "__main__":
    key = jax.random.PRNGKey(0)
    ks = jax.random.split(key, 10)

    # --- Check 1: module-consistent small shapes (single block), f32 MXU -----
    B, S, DIM_MODEL, HIDDEN = 2, 8, 32, 64
    params1 = _make_params(ks[0:4], DIM_MODEL, HIDDEN)
    # f32 MXU inputs here to satisfy the tight tolerance; production default
    # (prepare_params without the override) is bf16 weights + f32 accumulation.
    prepped1 = prepare_params(params1, mxu_dtype=jnp.float32)
    x1 = jax.random.normal(ks[4], (B, S, DIM_MODEL), jnp.float32)
    out1 = jax.block_until_ready(position_wise_feed_forward(x1, prepped1))
    ref1 = _reference(x1, params1)
    assert out1.shape == (B, S, DIM_MODEL)
    assert jnp.allclose(out1, ref1, rtol=1e-3, atol=1e-3), "check 1 mismatch"

    # --- Check 2: exercises row tiling with a masked partial last block (no
    #     wrapper pad) and hidden(K)-axis streaming into the f32 accumulator ---
    B2, S2, M2, H2 = 2, 300, 64, 256
    params2 = _make_params(ks[5:9], M2, H2)
    prepped2 = prepare_params(params2, mxu_dtype=jnp.float32)
    x2 = jax.random.normal(ks[9], (B2, S2, M2), jnp.float32)
    out2 = jax.block_until_ready(
        position_wise_feed_forward(x2, prepped2, row_tile=256, hidden_tile=128))
    ref2 = _reference(x2, params2)
    assert out2.shape == (B2, S2, M2)
    assert jnp.allclose(out2, ref2, rtol=1e-3, atol=1e-3), "check 2 mismatch"

    print("KERNEL_OK")
</pallas_src>

<mosaic_0001>
module attributes {stable_mosaic.version = 11 : i64} {
  func.func @_ffn_kernel(%arg0: i32, %arg1: i32, %arg2: memref<16x32xf32, #tpu.memory_space<vmem>>, %arg3: memref<32x64xf32, #tpu.memory_space<vmem>>, %arg4: memref<1x64xf32, #tpu.memory_space<vmem>>, %arg5: memref<64x32xf32, #tpu.memory_space<vmem>>, %arg6: memref<1x32xf32, #tpu.memory_space<vmem>>, %arg7: memref<1x32xf32, #tpu.memory_space<vmem>>, %arg8: memref<1x32xf32, #tpu.memory_space<vmem>>, %arg9: memref<16x32xf32, #tpu.memory_space<vmem>>, %arg10: memref<16x32xf32, #tpu.memory_space<vmem>>) attributes {dimension_semantics = [#tpu.dimension_semantics<parallel>, #tpu.dimension_semantics<arbitrary>], iteration_bounds = array<i64: 1, 1>, scalar_prefetch = 0 : i64, scratch_operands = 1 : i64, tpu.core_type = #tpu.core_type<tc>, window_params = [{transform_indices = @transform_0, window_bounds = array<i64: 16, 32>}, {pipeline_mode = #tpu.pipeline_mode<synchronous>, transform_indices = @transform_1, window_bounds = array<i64: 32, 64>}, {pipeline_mode = #tpu.pipeline_mode<synchronous>, transform_indices = @transform_2, window_bounds = array<i64: 1, 64>}, {pipeline_mode = #tpu.pipeline_mode<synchronous>, transform_indices = @transform_3, window_bounds = array<i64: 64, 32>}, {pipeline_mode = #tpu.pipeline_mode<synchronous>, transform_indices = @transform_4, window_bounds = array<i64: 1, 32>}, {pipeline_mode = #tpu.pipeline_mode<synchronous>, transform_indices = @transform_5, window_bounds = array<i64: 1, 32>}, {pipeline_mode = #tpu.pipeline_mode<synchronous>, transform_indices = @transform_6, window_bounds = array<i64: 1, 32>}, {transform_indices = @transform_7, window_bounds = array<i64: 16, 32>}]} {
    %c0_i32 = arith.constant 0 : i32
    %0 = arith.cmpi eq, %arg1, %c0_i32 : i32
    %1 = arith.extui %0 : i1 to i32
    %c0_i32_0 = arith.constant 0 : i32
    %2 = arith.cmpi ne, %1, %c0_i32_0 : i32
    scf.if %2 {
      %cst_16 = arith.constant 0.000000e+00 : f32
      %19 = vector.broadcast %cst_16 : f32 to vector<16x32xf32>
      %c0_17 = arith.constant 0 : index
      %c0_18 = arith.constant 0 : index
      %20 = vector.load %arg10[%c0_17, %c0_18] : memref<16x32xf32, #tpu.memory_space<vmem>>, vector<16x32xf32>
      tpu.vector_store %arg10[%c0_17, %c0_18], %19 {strides = array<i32>} : memref<16x32xf32, #tpu.memory_space<vmem>>, vector<16x32xf32>,
    } else {
    }
    %c0 = arith.constant 0 : index
    %c0_1 = arith.constant 0 : index
    %3 = vector.load %arg2[%c0, %c0_1] : memref<16x32xf32, #tpu.memory_space<vmem>>, vector<16x32xf32>
    %c0_2 = arith.constant 0 : index
    %c0_3 = arith.constant 0 : index
    %4 = vector.load %arg3[%c0_2, %c0_3] : memref<32x64xf32, #tpu.memory_space<vmem>>, vector<32x64xf32>
    %cst = arith.constant dense<0.000000e+00> : vector<16x64xf32>
    %5 = tpu.matmul %3, %4, %cst {dimension_numbers = #tpu.dot_dimension_numbers<[1], [0], [0], [1], [0, 0, 1, 1], [], []>} : vector<16x32xf32>, vector<32x64xf32>, vector<16x64xf32> -> vector<16x64xf32>
    %c0_4 = arith.constant 0 : index
    %c0_5 = arith.constant 0 : index
    %6 = vector.load %arg4[%c0_4, %c0_5] : memref<1x64xf32, #tpu.memory_space<vmem>>, vector<1x64xf32>
    %7 = vector.broadcast %6 : vector<1x64xf32> to vector<16x64xf32>
    %8 = arith.addf %5, %7 : vector<16x64xf32>
    %cst_6 = arith.constant 0.000000e+00 : f32
    %9 = vector.broadcast %cst_6 : f32 to vector<16x64xf32>
    %10 = arith.maximumf %8, %9 : vector<16x64xf32>
    %c0_7 = arith.constant 0 : index
    %c0_8 = arith.constant 0 : index
    %11 = vector.load %arg5[%c0_7, %c0_8] : memref<64x32xf32, #tpu.memory_space<vmem>>, vector<64x32xf32>
    %c0_9 = arith.constant 0 : index
    %c0_10 = arith.constant 0 : index
    %12 = vector.load %arg10[%c0_9, %c0_10] : memref<16x32xf32, #tpu.memory_space<vmem>>, vector<16x32xf32>
    %cst_11 = arith.constant dense<0.000000e+00> : vector<16x32xf32>
    %13 = tpu.matmul %10, %11, %cst_11 {dimension_numbers = #tpu.dot_dimension_numbers<[1], [0], [0], [1], [0, 0, 1, 1], [], []>} : vector<16x64xf32>, vector<64x32xf32>, vector<16x32xf32> -> vector<16x32xf32>
    %14 = arith.addf %12, %13 : vector<16x32xf32>
    %c0_12 = arith.constant 0 : index
    %c0_13 = arith.constant 0 : index
    %15 = vector.load %arg10[%c0_12, %c0_13] : memref<16x32xf32, #tpu.memory_space<vmem>>, vector<16x32xf32>
    tpu.vector_store %arg10[%c0_12, %c0_13], %14 {strides = array<i32>} : memref<16x32xf32, #tpu.memory_space<vmem>>, vector<16x32xf32>,
    %c0_i32_14 = arith.constant 0 : i32
    %16 = arith.cmpi eq, %arg1, %c0_i32_14 : i32
    %17 = arith.extui %16 : i1 to i32
    %c0_i32_15 = arith.constant 0 : i32
    %18 = arith.cmpi ne, %17, %c0_i32_15 : i32
    scf.if %18 {
      %c0_16 = arith.constant 0 : index
      %c0_17 = arith.constant 0 : index
      %19 = vector.load %arg10[%c0_16, %c0_17] : memref<16x32xf32, #tpu.memory_space<vmem>>, vector<16x32xf32>
      %c0_18 = arith.constant 0 : index
      %c0_19 = arith.constant 0 : index
      %20 = vector.load %arg6[%c0_18, %c0_19] : memref<1x32xf32, #tpu.memory_space<vmem>>, vector<1x32xf32>
      %21 = vector.broadcast %20 : vector<1x32xf32> to vector<16x32xf32>
      %22 = arith.addf %19, %21 : vector<16x32xf32>
      %23 = arith.addf %22, %3 : vector<16x32xf32>
      %cst_20 = arith.constant dense<0.000000e+00> : vector<16xf32>
      %24 = vector.multi_reduction <add>, %23, %cst_20 [1] : vector<16x32xf32> to vector<16xf32>
      %25 = vector.shape_cast %24 : vector<16xf32> to vector<16x1xf32>
      %cst_21 = arith.constant 3.200000e+01 : f32
      %26 = vector.broadcast %cst_21 : f32 to vector<16x1xf32>
      %27 = arith.divf %25, %26 : vector<16x1xf32>
      %28 = vector.broadcast %27 : vector<16x1xf32> to vector<16x32xf32>
      %29 = arith.subf %23, %28 : vector<16x32xf32>
      %30 = arith.mulf %29, %29 : vector<16x32xf32>
      %cst_22 = arith.constant dense<0.000000e+00> : vector<16xf32>
      %31 = vector.multi_reduction <add>, %30, %cst_22 [1] : vector<16x32xf32> to vector<16xf32>
      %32 = vector.shape_cast %31 : vector<16xf32> to vector<16x1xf32>
      %cst_23 = arith.constant 3.200000e+01 : f32
      %33 = vector.broadcast %cst_23 : f32 to vector<16x1xf32>
      %34 = arith.divf %32, %33 : vector<16x1xf32>
      %35 = vector.broadcast %27 : vector<16x1xf32> to vector<16x32xf32>
      %36 = arith.subf %23, %35 : vector<16x32xf32>
      %cst_24 = arith.constant 9.99999974E-6 : f32
      %37 = vector.broadcast %cst_24 : f32 to vector<16x1xf32>
      %38 = arith.addf %34, %37 : vector<16x1xf32>
      %39 = math.rsqrt %38 : vector<16x1xf32>
      %40 = vector.broadcast %39 : vector<16x1xf32> to vector<16x32xf32>
      %41 = arith.mulf %36, %40 : vector<16x32xf32>
      %c0_25 = arith.constant 0 : index
      %c0_26 = arith.constant 0 : index
      %42 = vector.load %arg7[%c0_25, %c0_26] : memref<1x32xf32, #tpu.memory_space<vmem>>, vector<1x32xf32>
      %43 = vector.broadcast %42 : vector<1x32xf32> to vector<16x32xf32>
      %44 = arith.mulf %41, %43 : vector<16x32xf32>
      %c0_27 = arith.constant 0 : index
      %c0_28 = arith.constant 0 : index
      %45 = vector.load %arg8[%c0_27, %c0_28] : memref<1x32xf32, #tpu.memory_space<vmem>>, vector<1x32xf32>
      %46 = vector.broadcast %45 : vector<1x32xf32> to vector<16x32xf32>
      %47 = arith.addf %44, %46 : vector<16x32xf32>
      %c0_29 = arith.constant 0 : index
      %c0_30 = arith.constant 0 : index
      %48 = vector.load %arg9[%c0_29, %c0_30] : memref<16x32xf32, #tpu.memory_space<vmem>>, vector<16x32xf32>
      tpu.vector_store %arg9[%c0_29, %c0_30], %47 {strides = array<i32>} : memref<16x32xf32, #tpu.memory_space<vmem>>, vector<16x32xf32>,
    } else {
    }
    return
  }
  func.func @transform_0(%arg0: i32, %arg1: i32) -> (i32, i32) {
    %c0_i32 = arith.constant 0 : i32
    %c0_i32_0 = arith.constant 0 : i32
    return %arg0, %c0_i32 : i32, i32
  }
  func.func @transform_1(%arg0: i32, %arg1: i32) -> (i32, i32) {
    %c0_i32 = arith.constant 0 : i32
    %c0_i32_0 = arith.constant 0 : i32
    return %c0_i32, %arg1 : i32, i32
  }
  func.func @transform_2(%arg0: i32, %arg1: i32) -> (i32, i32) {
    %c0_i32 = arith.constant 0 : i32
    %c0_i32_0 = arith.constant 0 : i32
    return %c0_i32, %arg1 : i32, i32
  }
  func.func @transform_3(%arg0: i32, %arg1: i32) -> (i32, i32) {
    %c0_i32 = arith.constant 0 : i32
    %c0_i32_0 = arith.constant 0 : i32
    return %arg1, %c0_i32 : i32, i32
  }
  func.func @transform_4(%arg0: i32, %arg1: i32) -> (i32, i32) {
    %c0_i32 = arith.constant 0 : i32
    %c0_i32_0 = arith.constant 0 : i32
    %c0_i32_1 = arith.constant 0 : i32
    return %c0_i32, %c0_i32_0 : i32, i32
  }
  func.func @transform_5(%arg0: i32, %arg1: i32) -> (i32, i32) {
    %c0_i32 = arith.constant 0 : i32
    %c0_i32_0 = arith.constant 0 : i32
    %c0_i32_1 = arith.constant 0 : i32
    return %c0_i32, %c0_i32_0 : i32, i32
  }
  func.func @transform_6(%arg0: i32, %arg1: i32) -> (i32, i32) {
    %c0_i32 = arith.constant 0 : i32
    %c0_i32_0 = arith.constant 0 : i32
    %c0_i32_1 = arith.constant 0 : i32
    return %c0_i32, %c0_i32_0 : i32, i32
  }
  func.func @transform_7(%arg0: i32, %arg1: i32) -> (i32, i32) {
    %c0_i32 = arith.constant 0 : i32
    %c0_i32_0 = arith.constant 0 : i32
    return %arg0, %c0_i32 : i32, i32
  }
}

module attributes {stable_mosaic.version = 11 : i64} {
  func.func @_ffn_kernel(%arg0: i32, %arg1: i32, %arg2: memref<16x32xf32, #tpu.memory_space<vmem>>, %arg3: memref<32x64xf32, #tpu.memory_space<vmem>>, %arg4: memref<1x64xf32, #tpu.memory_space<vmem>>, %arg5: memref<64x32xf32, #tpu.memory_space<vmem>>, %arg6: memref<1x32xf32, #tpu.memory_space<vmem>>, %arg7: memref<1x32xf32, #tpu.memory_space<vmem>>, %arg8: memref<1x32xf32, #tpu.memory_space<vmem>>, %arg9: memref<16x32xf32, #tpu.memory_space<vmem>>, %arg10: memref<16x32xf32, #tpu.memory_space<vmem>>) attributes {dimension_semantics = [#tpu.dimension_semantics<parallel>, #tpu.dimension_semantics<arbitrary>], iteration_bounds = array<i64: 1, 1>, scalar_prefetch = 0 : i64, scratch_operands = 1 : i64, tpu.core_type = #tpu.core_type<tc>, window_params = [{transform_indices = @transform_0, window_bounds = array<i64: 16, 32>}, {transform_indices = @transform_1, window_bounds = array<i64: 32, 64>}, {transform_indices = @transform_2, window_bounds = array<i64: 1, 64>}, {transform_indices = @transform_3, window_bounds = array<i64: 64, 32>}, {pipeline_mode = #tpu.pipeline_mode<synchronous>, transform_indices = @transform_4, window_bounds = array<i64: 1, 32>}, {pipeline_mode = #tpu.pipeline_mode<synchronous>, transform_indices = @transform_5, window_bounds = array<i64: 1, 32>}, {pipeline_mode = #tpu.pipeline_mode<synchronous>, transform_indices = @transform_6, window_bounds = array<i64: 1, 32>}, {transform_indices = @transform_7, window_bounds = array<i64: 16, 32>}]} {
    %c0_i32 = arith.constant 0 : i32
    %0 = arith.cmpi eq, %arg1, %c0_i32 : i32
    %1 = arith.extui %0 : i1 to i32
    %c0_i32_0 = arith.constant 0 : i32
    %2 = arith.cmpi ne, %1, %c0_i32_0 : i32
    scf.if %2 {
      %cst_16 = arith.constant 0.000000e+00 : f32
      %19 = vector.broadcast %cst_16 : f32 to vector<16x32xf32>
      %c0_17 = arith.constant 0 : index
      %c0_18 = arith.constant 0 : index
      %20 = vector.load %arg10[%c0_17, %c0_18] : memref<16x32xf32, #tpu.memory_space<vmem>>, vector<16x32xf32>
      tpu.vector_store %arg10[%c0_17, %c0_18], %19 {strides = array<i32>} : memref<16x32xf32, #tpu.memory_space<vmem>>, vector<16x32xf32>,
    } else {
    }
    %c0 = arith.constant 0 : index
    %c0_1 = arith.constant 0 : index
    %3 = vector.load %arg2[%c0, %c0_1] : memref<16x32xf32, #tpu.memory_space<vmem>>, vector<16x32xf32>
    %c0_2 = arith.constant 0 : index
    %c0_3 = arith.constant 0 : index
    %4 = vector.load %arg3[%c0_2, %c0_3] : memref<32x64xf32, #tpu.memory_space<vmem>>, vector<32x64xf32>
    %cst = arith.constant dense<0.000000e+00> : vector<16x64xf32>
    %5 = tpu.matmul %3, %4, %cst {dimension_numbers = #tpu.dot_dimension_numbers<[1], [0], [0], [1], [0, 0, 1, 1], [], []>} : vector<16x32xf32>, vector<32x64xf32>, vector<16x64xf32> -> vector<16x64xf32>
    %c0_4 = arith.constant 0 : index
    %c0_5 = arith.constant 0 : index
    %6 = vector.load %arg4[%c0_4, %c0_5] : memref<1x64xf32, #tpu.memory_space<vmem>>, vector<1x64xf32>
    %7 = vector.broadcast %6 : vector<1x64xf32> to vector<16x64xf32>
    %8 = arith.addf %5, %7 : vector<16x64xf32>
    %cst_6 = arith.constant 0.000000e+00 : f32
    %9 = vector.broadcast %cst_6 : f32 to vector<16x64xf32>
    %10 = arith.maximumf %8, %9 : vector<16x64xf32>
    %c0_7 = arith.constant 0 : index
    %c0_8 = arith.constant 0 : index
    %11 = vector.load %arg5[%c0_7, %c0_8] : memref<64x32xf32, #tpu.memory_space<vmem>>, vector<64x32xf32>
    %c0_9 = arith.constant 0 : index
    %c0_10 = arith.constant 0 : index
    %12 = vector.load %arg10[%c0_9, %c0_10] : memref<16x32xf32, #tpu.memory_space<vmem>>, vector<16x32xf32>
    %cst_11 = arith.constant dense<0.000000e+00> : vector<16x32xf32>
    %13 = tpu.matmul %10, %11, %cst_11 {dimension_numbers = #tpu.dot_dimension_numbers<[1], [0], [0], [1], [0, 0, 1, 1], [], []>} : vector<16x64xf32>, vector<64x32xf32>, vector<16x32xf32> -> vector<16x32xf32>
    %14 = arith.addf %12, %13 : vector<16x32xf32>
    %c0_12 = arith.constant 0 : index
    %c0_13 = arith.constant 0 : index
    %15 = vector.load %arg10[%c0_12, %c0_13] : memref<16x32xf32, #tpu.memory_space<vmem>>, vector<16x32xf32>
    tpu.vector_store %arg10[%c0_12, %c0_13], %14 {strides = array<i32>} : memref<16x32xf32, #tpu.memory_space<vmem>>, vector<16x32xf32>,
    %c0_i32_14 = arith.constant 0 : i32
    %16 = arith.cmpi eq, %arg1, %c0_i32_14 : i32
    %17 = arith.extui %16 : i1 to i32
    %c0_i32_15 = arith.constant 0 : i32
    %18 = arith.cmpi ne, %17, %c0_i32_15 : i32
    scf.if %18 {
      %c0_16 = arith.constant 0 : index
      %c0_17 = arith.constant 0 : index
      %19 = vector.load %arg10[%c0_16, %c0_17] : memref<16x32xf32, #tpu.memory_space<vmem>>, vector<16x32xf32>
      %c0_18 = arith.constant 0 : index
      %c0_19 = arith.constant 0 : index
      %20 = vector.load %arg6[%c0_18, %c0_19] : memref<1x32xf32, #tpu.memory_space<vmem>>, vector<1x32xf32>
      %21 = vector.broadcast %20 : vector<1x32xf32> to vector<16x32xf32>
      %22 = arith.addf %19, %21 : vector<16x32xf32>
      %23 = arith.addf %22, %3 : vector<16x32xf32>
      %cst_20 = arith.constant dense<0.000000e+00> : vector<16xf32>
      %24 = vector.multi_reduction <add>, %23, %cst_20 [1] : vector<16x32xf32> to vector<16xf32>
      %25 = vector.shape_cast %24 : vector<16xf32> to vector<16x1xf32>
      %cst_21 = arith.constant 3.200000e+01 : f32
      %26 = vector.broadcast %cst_21 : f32 to vector<16x1xf32>
      %27 = arith.divf %25, %26 : vector<16x1xf32>
      %28 = vector.broadcast %27 : vector<16x1xf32> to vector<16x32xf32>
      %29 = arith.subf %23, %28 : vector<16x32xf32>
      %30 = arith.mulf %29, %29 : vector<16x32xf32>
      %cst_22 = arith.constant dense<0.000000e+00> : vector<16xf32>
      %31 = vector.multi_reduction <add>, %30, %cst_22 [1] : vector<16x32xf32> to vector<16xf32>
      %32 = vector.shape_cast %31 : vector<16xf32> to vector<16x1xf32>
      %cst_23 = arith.constant 3.200000e+01 : f32
      %33 = vector.broadcast %cst_23 : f32 to vector<16x1xf32>
      %34 = arith.divf %32, %33 : vector<16x1xf32>
      %35 = vector.broadcast %27 : vector<16x1xf32> to vector<16x32xf32>
      %36 = arith.subf %23, %35 : vector<16x32xf32>
      %cst_24 = arith.constant 9.99999974E-6 : f32
      %37 = vector.broadcast %cst_24 : f32 to vector<16x1xf32>
      %38 = arith.addf %34, %37 : vector<16x1xf32>
      %39 = math.rsqrt %38 : vector<16x1xf32>
      %40 = vector.broadcast %39 : vector<16x1xf32> to vector<16x32xf32>
      %41 = arith.mulf %36, %40 : vector<16x32xf32>
      %c0_25 = arith.constant 0 : index
      %c0_26 = arith.constant 0 : index
      %42 = vector.load %arg7[%c0_25, %c0_26] : memref<1x32xf32, #tpu.memory_space<vmem>>, vector<1x32xf32>
      %43 = vector.broadcast %42 : vector<1x32xf32> to vector<16x32xf32>
      %44 = arith.mulf %41, %43 : vector<16x32xf32>
      %c0_27 = arith.constant 0 : index
      %c0_28 = arith.constant 0 : index
      %45 = vector.load %arg8[%c0_27, %c0_28] : memref<1x32xf32, #tpu.memory_space<vmem>>, vector<1x32xf32>
      %46 = vector.broadcast %45 : vector<1x32xf32> to vector<16x32xf32>
      %47 = arith.addf %44, %46 : vector<16x32xf32>
      %c0_29 = arith.constant 0 : index
      %c0_30 = arith.constant 0 : index
      %48 = vector.load %arg9[%c0_29, %c0_30] : memref<16x32xf32, #tpu.memory_space<vmem>>, vector<16x32xf32>
      tpu.vector_store %arg9[%c0_29, %c0_30], %47 {strides = array<i32>} : memref<16x32xf32, #tpu.memory_space<vmem>>, vector<16x32xf32>,
    } else {
    }
    return
  }
  func.func @transform_0(%arg0: i32, %arg1: i32) -> (i32, i32) {
    %c0_i32 = arith.constant 0 : i32
    %c0_i32_0 = arith.constant 0 : i32
    return %arg0, %c0_i32 : i32, i32
  }
  func.func @transform_1(%arg0: i32, %arg1: i32) -> (i32, i32) {
    %c0_i32 = arith.constant 0 : i32
    %c0_i32_0 = arith.constant 0 : i32
    return %c0_i32, %arg1 : i32, i32
  }
  func.func @transform_2(%arg0: i32, %arg1: i32) -> (i32, i32) {
    %c0_i32 = arith.constant 0 : i32
    %c0_i32_0 = arith.constant 0 : i32
    return %c0_i32, %arg1 : i32, i32
  }
  func.func @transform_3(%arg0: i32, %arg1: i32) -> (i32, i32) {
    %c0_i32 = arith.constant 0 : i32
    %c0_i32_0 = arith.constant 0 : i32
    return %arg1, %c0_i32 : i32, i32
  }
  func.func @transform_4(%arg0: i32, %arg1: i32) -> (i32, i32) {
    %c0_i32 = arith.constant 0 : i32
    %c0_i32_0 = arith.constant 0 : i32
    %c0_i32_1 = arith.constant 0 : i32
    return %c0_i32, %c0_i32_0 : i32, i32
  }
  func.func @transform_5(%arg0: i32, %arg1: i32) -> (i32, i32) {
    %c0_i32 = arith.constant 0 : i32
    %c0_i32_0 = arith.constant 0 : i32
    %c0_i32_1 = arith.constant 0 : i32
    return %c0_i32, %c0_i32_0 : i32, i32
  }
  func.func @transform_6(%arg0: i32, %arg1: i32) -> (i32, i32) {
    %c0_i32 = arith.constant 0 : i32
    %c0_i32_0 = arith.constant 0 : i32
    %c0_i32_1 = arith.constant 0 : i32
    return %c0_i32, %c0_i32_0 : i32, i32
  }
  func.func @transform_7(%arg0: i32, %arg1: i32) -> (i32, i32) {
    %c0_i32 = arith.constant 0 : i32
    %c0_i32_0 = arith.constant 0 : i32
    return %arg0, %c0_i32 : i32, i32
  }
}

</mosaic_0001>

<bundles_post_ra>
// kernel: tpu_custom_call.1
= control target key start
LH: loop header
LB: loop body
LE: loop exit
PB: predicated region body
PF: predicated region fallthrough
CT: control target
= control target key end

     0   :  { %vm31_vm0 = vcmask 261120   ;;  %s387_s0 = inlined_call_operand.vmem [shape: f32[16,32], index: 0, kind: input, shape index: {}]   ;;  %s388_s1 = inlined_call_operand.vmem [shape: f32[32,64], index: 1, kind: input, shape index: {}]   ;;  %s389_s2 = inlined_call_operand.vmem [shape: f32[1,64], index: 2, kind: input, shape index: {}]   ;;  %s390_s3 = inlined_call_operand.vmem [shape: f32[64,32], index: 3, kind: input, shape index: {}]   ;;  %s391_s4 = inlined_call_operand.vmem [shape: f32[1,32], index: 4, kind: input, shape index: {}]   ;;  %s392_s5 = inlined_call_operand.vmem [shape: f32[1,32], index: 5, kind: input, shape index: {}]   ;;  %s393_s6 = inlined_call_operand.vmem [shape: f32[1,32], index: 6, kind: input, shape index: {}]   ;;  %s394_s7 = inlined_call_operand.hbm [shape: f32[16,32], index: 7, kind: output, shape index: {}]  }
   0x1   :  { %v39_v0 = vld [vmem:[%s388_s1 + $0x18] sm:$0xff]  ;;  %v38_v1 = vld [vmem:[%s388_s1 + $0x10] sm:$0xff]  ;;  %v37_v2 = vld [vmem:[%s388_s1 + $0x8] sm:$0xff] }
   0x2   :  { %63 = vmatpush.msra.mxu0 %v39_v0  ;;  %220 = vmatpush.msra.mxu3 %v39_v0  ;;  %v83_v3 = vld [vmem:[%s390_s3 + $0x38] sm:$0xff]  ;;  %v36_v4 = vld [vmem:[%s388_s1] sm:$0xff]  ;;  %v82_v5 = vld [vmem:[%s390_s3 + $0x30] sm:$0xff] }
   0x3   :  { %v34_v6 = vld [vmem:[%s387_s0] sm:$0xff]  ;;  %101 = vmatpush.msra.mxu1 %v83_v3  ;;  %224 = vmatpush.msra.mxu2 %v83_v3  ;;  %v35_v7 = vld [vmem:[%s387_s0 + $0x8] sm:$0xff] }
   0x4   :  { %64 = vmatpush.msra.mxu0 %v38_v1  ;;  %221 = vmatpush.msra.mxu3 %v38_v1 }
   0x6   :  { %65 = vmatpush.msra.mxu0 %v37_v2  ;;  %222 = vmatpush.msra.mxu3 %v37_v2 }
   0x7   :  { %12 = vsyncpa [#allocation4], 0  ;;  %102 = vmatpush.msra.mxu1 %v82_v5  ;;  %v81_v8 = vld [vmem:[%s390_s3 + $0x28] sm:$0xff]  ;;  %225 = vmatpush.msra.mxu2 %v82_v5  ;;  %v80_v9 = vld [vmem:[%s390_s3 + $0x20] sm:$0xff]  ;;  %v273_v14 = vmov 0.0   ;;  %vm86_vm1 = vcmask 523264  }
   0x8   :  { %66 = vmatpush.msra.mxu0 %v36_v4  ;;  %223 = vmatpush.msra.mxu3 %v36_v4  ;;  %v79_v10 = vld [vmem:[%s390_s3 + $0x18] sm:$0xff]  ;;  %v78_v11 = vld [vmem:[%s390_s3 + $0x10] sm:$0xff]  ;;  %v77_v12 = vld [vmem:[%s390_s3 + $0x8] sm:$0xff]  ;;  %32 = vst.msk [vmem:[#allocation2] sm:$0xff] %vm31_vm0, %v273_v14  ;;  %v274_v37 = vmov 32.0   ;;  %s276_s12 = smov 128  }
   0x9   :  { %216 = vmatmul.msk.f32.vlgmr.msra.gmra.mxu0 %vm31_vm0, %v34_v6  ;;  %217 = vmatmul.msk.f32.vlgmr.msra.gmra.mxu3 %vm31_vm0, %v35_v7  ;;  %v76_v13 = vld [vmem:[%s390_s3] sm:$0xff]  ;;  %33 = vst.msk [vmem:[#allocation2 + $0x8] sm:$0xff] %vm31_vm0, %v273_v14  ;;  %241 = vrcp.f32 %v274_v37  ;;  %s277_s13 = smov 8  }
   0xa   :  { %103 = vmatpush.msra.mxu1 %v81_v8  ;;  %226 = vmatpush.msra.mxu2 %v81_v8  ;;  %v237_v15 = vld [vmem:[%s389_s2] ss:$0 sm:$0xff] }
   0xb   :  { %v238_v25 = vld [vmem:[%s391_s4] ss:$0 sm:$0xff] }
   0xc   :  { %104 = vmatpush.msra.mxu1 %v80_v9  ;;  %227 = vmatpush.msra.mxu2 %v80_v9  ;;  %v239_v2 = vld [vmem:[%s392_s5] ss:$0 sm:$0xff]  ;;  %s275_s5 = smov [#allocation3]  }
   0xd   :  { %s202_s9 = sshll.u32 %s275_s5, 4  ;;  %s203_s9 = int_to_ptr.vmem [resolvable:$true] %s202_s9 }
   0xe   :  { %105 = vmatpush.msra.mxu1 %v79_v10  ;;  %228 = vmatpush.msra.mxu2 %v79_v10 }
   0xf   :  { %v84_v22 = vld [vmem:[#allocation2] sm:$0xff]  ;;  %v242_v38 = vpop.eup %241 }
  0x10   :  { %106 = vmatpush.msra.mxu1 %v78_v11  ;;  %229 = vmatpush.msra.mxu2 %v78_v11  ;;  %v85_v26 = vld [vmem:[#allocation2 + $0x8] sm:$0xff]  ;;  %v140_v39 = vmul.f32 32.0, %v242_v38  ;;  %vm144_vm2 = vweird.f32 %v242_v38 }
  0x12   :  { %107 = vmatpush.msra.mxu1 %v77_v12  ;;  %230 = vmatpush.msra.mxu2 %v77_v12  ;;  %v141_v40 = vsub.f32 1.0, %v140_v39 }
  0x14   :  { %108 = vmatpush.msra.mxu1 %v76_v13  ;;  %231 = vmatpush.msra.mxu2 %v76_v13  ;;  %v142_v41 = vmul.f32 %v242_v38, %v141_v40 }
  0x16   :  { %v143_v42 = vadd.f32 %v242_v38, %v142_v41 }
  0x18   :  { %v145_v43 = vsel %vm144_vm2, %v242_v38, %v143_v42 }
  0x86   :  { %v68_v16 = vpop.f32.mrf.mxu0 }
  0x87   :  { %v69_v17 = vadd.f32 %v237_v15, %v68_v16 }
  0x89   :  { %v74_v18 = vmax.f32 %v69_v17, 0.0 }
  0x8b   :  { %218 = vmatmul.msk.f32.vlgmr.msra.gmra.mxu1 %vm86_vm1, %v74_v18 }
  0x8c   :  { %v71_v19 = vpop.f32.mrf.mxu3 }
  0x8d   :  { %v72_v20 = vadd.f32 %v237_v15, %v71_v19 }
  0x8f   :  { %v75_v21 = vmax.f32 %v72_v20, 0.0 }
  0x91   :  { %219 = vmatmul.msk.f32.vlgmr.msra.gmra.mxu2 %vm86_vm1, %v75_v21 }
 0x108   :  { %v110_v23 = vpop.f32.mrf.mxu1 }
 0x109   :  { %v116_v24 = vadd.f32 %v110_v23, %v84_v22 }
 0x10b   :  { %118 = vst.msk [vmem:[#allocation2] sm:$0xff] %vm31_vm0, %v116_v24 }
 0x112   :  { %v123_v27 = vld [vmem:[#allocation2] sm:$0xff] }
 0x113   :  { %v129_v28 = vadd.f32 %v238_v25, %v123_v27 }
 0x114   :  { %v113_v29 = vpop.f32.mrf.mxu2 }
 0x115   :  { %v117_v30 = vadd.f32 %v113_v29, %v85_v26  ;;  %v131_v31 = vadd.f32 %v129_v28, %v34_v6  ;;  %v240_v6 = vld [vmem:[%s393_s6] ss:$0 sm:$0xff]  ;;  %s204_s6 = sshll.u32 %s394_s7, 4  ;;  %s205_s6 = int_to_ptr.hbm [resolvable:$true] %s204_s6 }
 0x117   :  { %119 = vst.msk [vmem:[#allocation2 + $0x8] sm:$0xff] %vm31_vm0, %v117_v30  ;;  %v133_v32 = vsel %vm31_vm0, %v131_v31, 0.0 }
 0x118   :  { %134 = vadd.xlane.f32.xlu0 %v133_v32 }
 0x11e   :  { %v124_v33 = vld [vmem:[#allocation2 + $0x8] sm:$0xff] }
 0x11f   :  { %v130_v34 = vadd.f32 %v238_v25, %v124_v33 }
 0x121   :  { %v132_v35 = vadd.f32 %v130_v34, %v35_v7 }
 0x123   :  { %v136_v36 = vsel %vm31_vm0, %v132_v35, 0.0 }
 0x124   :  { %137 = vadd.xlane.f32.xlu0 %v136_v36 }
 0x18b   :  { %v135_v44 = vpop.xlane.xlu0 %134 }
 0x18c   :  { %v146_v45 = vmul.f32 %v145_v43, %v135_v44 }
 0x18e   :  { %v148_v46 = vsub.f32 %v131_v31, %v146_v45 }
 0x190   :  { %v150_v47 = vmul.f32 %v148_v46, %v148_v46 }
 0x192   :  { %v152_v48 = vsel %vm31_vm0, %v150_v47, 0.0 }
 0x193   :  { %153 = vadd.xlane.f32.xlu1 %v152_v48 }
 0x197   :  { %v138_v49 = vpop.xlane.xlu0 %137 }
 0x198   :  { %v147_v50 = vmul.f32 %v145_v43, %v138_v49 }
 0x19a   :  { %v149_v51 = vsub.f32 %v132_v35, %v147_v50 }
 0x19c   :  { %v151_v52 = vmul.f32 %v149_v51, %v149_v51 }
 0x19e   :  { %v155_v53 = vsel %vm31_vm0, %v151_v52, 0.0 }
 0x19f   :  { %156 = vadd.xlane.f32.xlu1 %v155_v53 }
 0x206   :  { %v154_v54 = vpop.xlane.xlu1 %153 }
 0x207   :  { %v158_v55 = vmul.f32 %v154_v54, %v145_v43 }
 0x209   :  { %v160_v56 = vadd.f32 1e-05, %v158_v55 }
 0x20b   :  { %243 = vrsqrt.f32 %v160_v56  ;;  %vm168_vm4 = vweird.f32 %v160_v56 }
 0x211   :  { %v244_v57 = vpop.eup %243 }
 0x212   :  { %v163_v58 = vmul.f32 %v244_v57, %v160_v56  ;;  %v157_v59 = vpop.xlane.xlu1 %156  ;;  %vm169_vm3 = vweird.f32 %v244_v57 }
 0x213   :  { %v159_v60 = vmul.f32 %v157_v59, %v145_v43  ;;  %vm170_vm5 = vmor %vm168_vm4, %vm169_vm3 }
 0x214   :  { %v164_v61 = vmul.f32 %v244_v57, %v163_v58 }
 0x215   :  { %v161_v62 = vadd.f32 1e-05, %v159_v60 }
 0x216   :  { %v165_v63 = vmul.f32 0.5, %v164_v61 }
 0x217   :  { %245 = vrsqrt.f32 %v161_v62  ;;  %vm178_vm7 = vweird.f32 %v161_v62 }
 0x218   :  { %v166_v0 = vsub.f32 1.5, %v165_v63 }
 0x21a   :  { %v167_v1 = vmul.f32 %v244_v57, %v166_v0 }
 0x21c   :  { %v171_v3 = vsel %vm170_vm5, %v244_v57, %v167_v1 }
 0x21d   :  { %v246_v4 = vpop.eup %245  ;;  %v182_v5 = vmul.f32 %v171_v3, %v148_v46 }
 0x21e   :  { %v173_v7 = vmul.f32 %v246_v4, %v161_v62  ;;  %vm179_vm6 = vweird.f32 %v246_v4 }
 0x21f   :  { %v188_v8 = vmul.f32 %v239_v2, %v182_v5  ;;  %vm180_vm8 = vmor %vm178_vm7, %vm179_vm6 }
 0x220   :  { %v174_v9 = vmul.f32 %v246_v4, %v173_v7 }
 0x221   :  { %v194_v10 = vadd.f32 %v240_v6, %v188_v8 }
 0x222   :  { %v175_v11 = vmul.f32 0.5, %v174_v9 }
 0x223   :  { %196 = vst.msk [vmem:[#allocation3] sm:$0xff] %vm31_vm0, %v194_v10 }
 0x224   :  { %v176_v12 = vsub.f32 1.5, %v175_v11 }
 0x226   :  { %v177_v13 = vmul.f32 %v246_v4, %v176_v12 }
 0x228   :  { %v181_v14 = vsel %vm180_vm8, %v246_v4, %v177_v13 }
 0x229   :  { %v183_v15 = vmul.f32 %v181_v14, %v149_v51 }
 0x22b   :  { %v189_v16 = vmul.f32 %v239_v2, %v183_v15 }
 0x22d   :  { %v195_v17 = vadd.f32 %v240_v6, %v189_v16 }
 0x22f   :  { %197 = vst.msk [vmem:[#allocation3 + $0x8] sm:$0xff] %vm31_vm0, %v195_v17 }
 0x230   :  { %210 = dma.vmem_to_hbm [thread:$0]  %s203_s9, 256, %s205_s6, [#allocation4], %s276_s12, %s276_s12, %s277_s13  }
 0x231   :  { %271 = dma.done.wait [#allocation4], 256  }
 0x232   :  { %272 = vsyncadd [#allocation4], 4294967040 }
 0x233   :  { %215 = vsyncpa [#allocation4], 1 }

// kernel: tpu_custom_call.1
= control target key start
LH: loop header
LB: loop body
LE: loop exit
PB: predicated region body
PF: predicated region fallthrough
CT: control target
= control target key end

     0   :  { %vm31_vm0 = vcmask 261120   ;;  %s387_s0 = inlined_call_operand.vmem [shape: f32[16,32], index: 0, kind: input, shape index: {}]   ;;  %s388_s1 = inlined_call_operand.vmem [shape: f32[32,64], index: 1, kind: input, shape index: {}]   ;;  %s389_s2 = inlined_call_operand.vmem [shape: f32[1,64], index: 2, kind: input, shape index: {}]   ;;  %s390_s3 = inlined_call_operand.vmem [shape: f32[64,32], index: 3, kind: input, shape index: {}]   ;;  %s391_s4 = inlined_call_operand.vmem [shape: f32[1,32], index: 4, kind: input, shape index: {}]   ;;  %s392_s5 = inlined_call_operand.vmem [shape: f32[1,32], index: 5, kind: input, shape index: {}]   ;;  %s393_s6 = inlined_call_operand.vmem [shape: f32[1,32], index: 6, kind: input, shape index: {}]   ;;  %s394_s7 = inlined_call_operand.hbm [shape: f32[16,32], index: 7, kind: output, shape index: {}]  }
   0x1   :  { %v39_v0 = vld [vmem:[%s388_s1 + $0x18] sm:$0xff]  ;;  %v38_v1 = vld [vmem:[%s388_s1 + $0x10] sm:$0xff]  ;;  %v37_v2 = vld [vmem:[%s388_s1 + $0x8] sm:$0xff] }
   0x2   :  { %63 = vmatpush.msra.mxu0 %v39_v0  ;;  %220 = vmatpush.msra.mxu3 %v39_v0  ;;  %v83_v3 = vld [vmem:[%s390_s3 + $0x38] sm:$0xff]  ;;  %v36_v4 = vld [vmem:[%s388_s1] sm:$0xff]  ;;  %v82_v5 = vld [vmem:[%s390_s3 + $0x30] sm:$0xff] }
   0x3   :  { %v34_v6 = vld [vmem:[%s387_s0] sm:$0xff]  ;;  %101 = vmatpush.msra.mxu1 %v83_v3  ;;  %224 = vmatpush.msra.mxu2 %v83_v3  ;;  %v35_v7 = vld [vmem:[%s387_s0 + $0x8] sm:$0xff] }
   0x4   :  { %64 = vmatpush.msra.mxu0 %v38_v1  ;;  %221 = vmatpush.msra.mxu3 %v38_v1 }
   0x6   :  { %65 = vmatpush.msra.mxu0 %v37_v2  ;;  %222 = vmatpush.msra.mxu3 %v37_v2 }
   0x7   :  { %12 = vsyncpa [#allocation4], 0  ;;  %102 = vmatpush.msra.mxu1 %v82_v5  ;;  %v81_v8 = vld [vmem:[%s390_s3 + $0x28] sm:$0xff]  ;;  %225 = vmatpush.msra.mxu2 %v82_v5  ;;  %v80_v9 = vld [vmem:[%s390_s3 + $0x20] sm:$0xff]  ;;  %v273_v14 = vmov 0.0   ;;  %vm86_vm1 = vcmask 523264  }
   0x8   :  { %66 = vmatpush.msra.mxu0 %v36_v4  ;;  %223 = vmatpush.msra.mxu3 %v36_v4  ;;  %v79_v10 = vld [vmem:[%s390_s3 + $0x18] sm:$0xff]  ;;  %v78_v11 = vld [vmem:[%s390_s3 + $0x10] sm:$0xff]  ;;  %v77_v12 = vld [vmem:[%s390_s3 + $0x8] sm:$0xff]  ;;  %32 = vst.msk [vmem:[#allocation2] sm:$0xff] %vm31_vm0, %v273_v14  ;;  %v274_v37 = vmov 32.0   ;;  %s276_s12 = smov 128  }
   0x9   :  { %216 = vmatmul.msk.f32.vlgmr.msra.gmra.mxu0 %vm31_vm0, %v34_v6  ;;  %217 = vmatmul.msk.f32.vlgmr.msra.gmra.mxu3 %vm31_vm0, %v35_v7  ;;  %v76_v13 = vld [vmem:[%s390_s3] sm:$0xff]  ;;  %33 = vst.msk [vmem:[#allocation2 + $0x8] sm:$0xff] %vm31_vm0, %v273_v14  ;;  %241 = vrcp.f32 %v274_v37  ;;  %s277_s13 = smov 8  }
   0xa   :  { %103 = vmatpush.msra.mxu1 %v81_v8  ;;  %226 = vmatpush.msra.mxu2 %v81_v8  ;;  %v237_v15 = vld [vmem:[%s389_s2] ss:$0 sm:$0xff] }
   0xb   :  { %v238_v25 = vld [vmem:[%s391_s4] ss:$0 sm:$0xff] }
   0xc   :  { %104 = vmatpush.msra.mxu1 %v80_v9  ;;  %227 = vmatpush.msra.mxu2 %v80_v9  ;;  %v239_v2 = vld [vmem:[%s392_s5] ss:$0 sm:$0xff]  ;;  %s275_s5 = smov [#allocation3]  }
   0xd   :  { %s202_s9 = sshll.u32 %s275_s5, 4  ;;  %s203_s9 = int_to_ptr.vmem [resolvable:$true] %s202_s9 }
   0xe   :  { %105 = vmatpush.msra.mxu1 %v79_v10  ;;  %228 = vmatpush.msra.mxu2 %v79_v10 }
   0xf   :  { %v84_v22 = vld [vmem:[#allocation2] sm:$0xff]  ;;  %v242_v38 = vpop.eup %241 }
  0x10   :  { %106 = vmatpush.msra.mxu1 %v78_v11  ;;  %229 = vmatpush.msra.mxu2 %v78_v11  ;;  %v85_v26 = vld [vmem:[#allocation2 + $0x8] sm:$0xff]  ;;  %v140_v39 = vmul.f32 32.0, %v242_v38  ;;  %vm144_vm2 = vweird.f32 %v242_v38 }
  0x12   :  { %107 = vmatpush.msra.mxu1 %v77_v12  ;;  %230 = vmatpush.msra.mxu2 %v77_v12  ;;  %v141_v40 = vsub.f32 1.0, %v140_v39 }
  0x14   :  { %108 = vmatpush.msra.mxu1 %v76_v13  ;;  %231 = vmatpush.msra.mxu2 %v76_v13  ;;  %v142_v41 = vmul.f32 %v242_v38, %v141_v40 }
  0x16   :  { %v143_v42 = vadd.f32 %v242_v38, %v142_v41 }
  0x18   :  { %v145_v43 = vsel %vm144_vm2, %v242_v38, %v143_v42 }
  0x86   :  { %v68_v16 = vpop.f32.mrf.mxu0 }
  0x87   :  { %v69_v17 = vadd.f32 %v237_v15, %v68_v16 }
  0x89   :  { %v74_v18 = vmax.f32 %v69_v17, 0.0 }
  0x8b   :  { %218 = vmatmul.msk.f32.vlgmr.msra.gmra.mxu1 %vm86_vm1, %v74_v18 }
  0x8c   :  { %v71_v19 = vpop.f32.mrf.mxu3 }
  0x8d   :  { %v72_v20 = vadd.f32 %v237_v15, %v71_v19 }
  0x8f   :  { %v75_v21 = vmax.f32 %v72_v20, 0.0 }
  0x91   :  { %219 = vmatmul.msk.f32.vlgmr.msra.gmra.mxu2 %vm86_vm1, %v75_v21 }
 0x108   :  { %v110_v23 = vpop.f32.mrf.mxu1 }
 0x109   :  { %v116_v24 = vadd.f32 %v110_v23, %v84_v22 }
 0x10b   :  { %118 = vst.msk [vmem:[#allocation2] sm:$0xff] %vm31_vm0, %v116_v24 }
 0x112   :  { %v123_v27 = vld [vmem:[#allocation2] sm:$0xff] }
 0x113   :  { %v129_v28 = vadd.f32 %v238_v25, %v123_v27 }
 0x114   :  { %v113_v29 = vpop.f32.mrf.mxu2 }
 0x115   :  { %v117_v30 = vadd.f32 %v113_v29, %v85_v26  ;;  %v131_v31 = vadd.f32 %v129_v28, %v34_v6  ;;  %v240_v6 = vld [vmem:[%s393_s6] ss:$0 sm:$0xff]  ;;  %s204_s6 = sshll.u32 %s394_s7, 4  ;;  %s205_s6 = int_to_ptr.hbm [resolvable:$true] %s204_s6 }
 0x117   :  { %119 = vst.msk [vmem:[#allocation2 + $0x8] sm:$0xff] %vm31_vm0, %v117_v30  ;;  %v133_v32 = vsel %vm31_vm0, %v131_v31, 0.0 }
 0x118   :  { %134 = vadd.xlane.f32.xlu0 %v133_v32 }
 0x11e   :  { %v124_v33 = vld [vmem:[#allocation2 + $0x8] sm:$0xff] }
 0x11f   :  { %v130_v34 = vadd.f32 %v238_v25, %v124_v33 }
 0x121   :  { %v132_v35 = vadd.f32 %v130_v34, %v35_v7 }
 0x123   :  { %v136_v36 = vsel %vm31_vm0, %v132_v35, 0.0 }
 0x124   :  { %137 = vadd.xlane.f32.xlu0 %v136_v36 }
 0x18b   :  { %v135_v44 = vpop.xlane.xlu0 %134 }
 0x18c   :  { %v146_v45 = vmul.f32 %v145_v43, %v135_v44 }
 0x18e   :  { %v148_v46 = vsub.f32 %v131_v31, %v146_v45 }
 0x190   :  { %v150_v47 = vmul.f32 %v148_v46, %v148_v46 }
 0x192   :  { %v152_v48 = vsel %vm31_vm0, %v150_v47, 0.0 }
 0x193   :  { %153 = vadd.xlane.f32.xlu1 %v152_v48 }
 0x197   :  { %v138_v49 = vpop.xlane.xlu0 %137 }
 0x198   :  { %v147_v50 = vmul.f32 %v145_v43, %v138_v49 }
 0x19a   :  { %v149_v51 = vsub.f32 %v132_v35, %v147_v50 }
 0x19c   :  { %v151_v52 = vmul.f32 %v149_v51, %v149_v51 }
 0x19e   :  { %v155_v53 = vsel %vm31_vm0, %v151_v52, 0.0 }
 0x19f   :  { %156 = vadd.xlane.f32.xlu1 %v155_v53 }
 0x206   :  { %v154_v54 = vpop.xlane.xlu1 %153 }
 0x207   :  { %v158_v55 = vmul.f32 %v154_v54, %v145_v43 }
 0x209   :  { %v160_v56 = vadd.f32 1e-05, %v158_v55 }
 0x20b   :  { %243 = vrsqrt.f32 %v160_v56  ;;  %vm168_vm4 = vweird.f32 %v160_v56 }
 0x211   :  { %v244_v57 = vpop.eup %243 }
 0x212   :  { %v163_v58 = vmul.f32 %v244_v57, %v160_v56  ;;  %v157_v59 = vpop.xlane.xlu1 %156  ;;  %vm169_vm3 = vweird.f32 %v244_v57 }
 0x213   :  { %v159_v60 = vmul.f32 %v157_v59, %v145_v43  ;;  %vm170_vm5 = vmor %vm168_vm4, %vm169_vm3 }
 0x214   :  { %v164_v61 = vmul.f32 %v244_v57, %v163_v58 }
 0x215   :  { %v161_v62 = vadd.f32 1e-05, %v159_v60 }
 0x216   :  { %v165_v63 = vmul.f32 0.5, %v164_v61 }
 0x217   :  { %245 = vrsqrt.f32 %v161_v62  ;;  %vm178_vm7 = vweird.f32 %v161_v62 }
 0x218   :  { %v166_v0 = vsub.f32 1.5, %v165_v63 }
 0x21a   :  { %v167_v1 = vmul.f32 %v244_v57, %v166_v0 }
 0x21c   :  { %v171_v3 = vsel %vm170_vm5, %v244_v57, %v167_v1 }
 0x21d   :  { %v246_v4 = vpop.eup %245  ;;  %v182_v5 = vmul.f32 %v171_v3, %v148_v46 }
 0x21e   :  { %v173_v7 = vmul.f32 %v246_v4, %v161_v62  ;;  %vm179_vm6 = vweird.f32 %v246_v4 }
 0x21f   :  { %v188_v8 = vmul.f32 %v239_v2, %v182_v5  ;;  %vm180_vm8 = vmor %vm178_vm7, %vm179_vm6 }
 0x220   :  { %v174_v9 = vmul.f32 %v246_v4, %v173_v7 }
 0x221   :  { %v194_v10 = vadd.f32 %v240_v6, %v188_v8 }
 0x222   :  { %v175_v11 = vmul.f32 0.5, %v174_v9 }
 0x223   :  { %196 = vst.msk [vmem:[#allocation3] sm:$0xff] %vm31_vm0, %v194_v10 }
 0x224   :  { %v176_v12 = vsub.f32 1.5, %v175_v11 }
 0x226   :  { %v177_v13 = vmul.f32 %v246_v4, %v176_v12 }
 0x228   :  { %v181_v14 = vsel %vm180_vm8, %v246_v4, %v177_v13 }
 0x229   :  { %v183_v15 = vmul.f32 %v181_v14, %v149_v51 }
 0x22b   :  { %v189_v16 = vmul.f32 %v239_v2, %v183_v15 }
 0x22d   :  { %v195_v17 = vadd.f32 %v240_v6, %v189_v16 }
 0x22f   :  { %197 = vst.msk [vmem:[#allocation3 + $0x8] sm:$0xff] %vm31_vm0, %v195_v17 }
 0x230   :  { %210 = dma.vmem_to_hbm [thread:$0]  %s203_s9, 256, %s205_s6, [#allocation4], %s276_s12, %s276_s12, %s277_s13  }
 0x231   :  { %271 = dma.done.wait [#allocation4], 256  }
 0x232   :  { %272 = vsyncadd [#allocation4], 4294967040 }
 0x233   :  { %215 = vsyncpa [#allocation4], 1 }

</bundles_post_ra>
